<compile_context>
chip_gen: v7x
topology: tpu7x:2x2x1
jax: 0.10.0
libtpu: 0.0.40
codegen_flags: <defaults>
</compile_context>

<pallas_src>
import functools

import jax
import jax.numpy as jnp
from jax.experimental import pallas as pl
from jax.experimental.pallas import tpu as pltpu

D_TARGET = 3                      # 'e3' euclidean target space of the jammy_flows pdf
NUM_FLOW_PARAMS = 2 * D_TARGET    # diagonal-gaussian 't' flow: 3 means + 3 log-widths
C_HIDDEN = 8                      # conv output channels of the synthetic encoder
KSIZE = 3
LANE = 128                        # lane width (v5e/v6e/v7x all have 128-lane vregs)
N_PAD = LANE                      # hidden / param / output lane padding


def _round_up(n, m):
    return (n + m - 1) // m * m


def _im2col_nchw(x, k=3, pad=1):
    """(B, C, H, W) -> (B, H*W, C*k*k) patches, 'same' padding, stride 1 (conv glue, plain JAX)."""
    B, C, H, W = x.shape
    xp = jnp.pad(x, ((0, 0), (0, 0), (pad, pad), (pad, pad)))
    taps = []
    for di in range(k):
        for dj in range(k):
            taps.append(xp[:, :, di:di + H, dj:dj + W])        # (B, C, H, W)
    p = jnp.stack(taps, axis=2)                                # (B, C, k*k, H, W)
    return p.transpose(0, 3, 4, 1, 2).reshape(B, H * W, C * k * k)


def prepare_params(params):
    """One-time weight layout prep (hoisted out of the per-call path).

    - conv weight -> (C*k*k, 128) im2col-matmul form, output lanes zero-padded (exact).
    - the fc layer is split into two lane layouts so the kernel never slices narrow lanes:
        wA/bA : mu weights in lanes [0, D), zero elsewhere
        wL/bL : log_sigma weights duplicated into lanes [0, D) and [D, 2D), zero elsewhere
                (=> exp() yields sigma at lanes [0, 2D) and exp(0)=1 on the padded lanes)
    """
    f32 = jnp.float32
    conv_w = params["conv_w"].astype(f32)
    w1 = conv_w.reshape(conv_w.shape[0], -1).T                           # (C*k*k, C_HIDDEN)
    w1p = jnp.pad(w1, ((0, 0), (0, N_PAD - C_HIDDEN)))                   # (C*k*k, 128)
    b1p = jnp.pad(params["conv_b"].astype(f32), (0, N_PAD - C_HIDDEN))[None, :]   # (1, 128)

    fc_w = params["fc_w"].astype(f32)                                    # (C_HIDDEN, 2D)
    fc_b = params["fc_b"].astype(f32)                                    # (2D,)
    wa = jnp.zeros((N_PAD, N_PAD), f32).at[:C_HIDDEN, :D_TARGET].set(fc_w[:, :D_TARGET])
    ba = jnp.zeros((1, N_PAD), f32).at[0, :D_TARGET].set(fc_b[:D_TARGET])
    wl = (jnp.zeros((N_PAD, N_PAD), f32)
          .at[:C_HIDDEN, :D_TARGET].set(fc_w[:, D_TARGET:])
          .at[:C_HIDDEN, D_TARGET:2 * D_TARGET].set(fc_w[:, D_TARGET:]))
    bl = (jnp.zeros((1, N_PAD), f32)
          .at[0, :D_TARGET].set(fc_b[D_TARGET:])
          .at[0, D_TARGET:2 * D_TARGET].set(fc_b[D_TARGET:]))
    return {"w1": w1p, "b1": b1p, "wA": wa, "bA": ba, "wL": wl, "bL": bl}


def prepare_noise(z):
    """(B, S, D) standard-normal noise -> kernel layout (B, D, S_pad), zero-padded lanes."""
    B, S, D = z.shape
    s_pad = _round_up(S, LANE)
    return jnp.pad(jnp.swapaxes(z, 1, 2), ((0, 0), (0, 0), (0, s_pad - S)))


def _combined_forward_kernel(patches_ref, w1_ref, b1_ref, wa_ref, ba_ref,
                             wl_ref, bl_ref, z_ref, out_ref, *, samplesize, hw):
    """Per batch item: encoder (conv-as-matmul + ReLU + GAP + fc) fused with affine-flow stats."""
    n_pad = out_ref.shape[-1]

    # ---- encoder conv as an im2col matmul (K=36, one MXU pass) + bias + ReLU ----
    h = jnp.dot(patches_ref[0], w1_ref[...], preferred_element_type=jnp.float32)  # (HW, 128)
    h = jnp.maximum(h + b1_ref[...], 0.0)

    # ---- global average pool over spatial positions (sublane-axis reduction) ----
    pooled = jnp.sum(h, axis=0, keepdims=True) * (1.0 / hw)                       # (1, 128)

    # ---- fc heads prepared at init: mu in lanes [0,D); sigma in lanes [0,2D), 1 elsewhere ----
    mu_sc = jnp.dot(pooled, wa_ref[...], preferred_element_type=jnp.float32) + ba_ref[...]
    log_sig = jnp.dot(pooled, wl_ref[...], preferred_element_type=jnp.float32) + bl_ref[...]
    sigma = jnp.exp(log_sig)                                                       # (1, 128)

    # ---- noise statistics with S on the 128 lanes; zero pads -> no mask needed ----
    z = z_ref[...]                                   # (1, D, S_pad)
    s1 = jnp.sum(z, axis=-1)                         # (1, D)
    s2 = jnp.sum(z * z, axis=-1)                     # (1, D)
    z_mean = s1 * (1.0 / samplesize)                 # (1, D)
    z_var = (s2 - z_mean * s1) * (1.0 / (samplesize - 1))    # unbiased (ddof=1)
    z_std = jnp.sqrt(z_var)                          # (1, D)

    # ---- scatter stats to lanes via tiny matmuls: mean -> [0,D), std -> [D,2D) ----
    row = jax.lax.broadcasted_iota(jnp.int32, (D_TARGET, n_pad), 0)
    lane = jax.lax.broadcasted_iota(jnp.int32, (D_TARGET, n_pad), 1)
    pm = (lane == row).astype(jnp.float32)
    ps = (lane == row + D_TARGET).astype(jnp.float32)
    z_sc = (jnp.dot(z_mean, pm, preferred_element_type=jnp.float32)
            + jnp.dot(z_std, ps, preferred_element_type=jnp.float32))             # (1, 128)

    # ---- affine flow identity: mean = mu + sigma*mean(z), std = sigma*std(z) ----
    # lanes [0,D): mu + sigma*z_mean; lanes [D,2D): 0 + sigma*z_std; lanes >=2D: 0 + 1*0 = 0
    out_ref[0] = mu_sc + sigma * z_sc                                              # one lane-dense store


@functools.partial(jax.jit, static_argnames=("samplesize",))
def combined_model_forward(x, prep, z_kernel, samplesize=1000):
    """x: (B, C, H, W) float32 NCHW; prep: prepare_params(...); z_kernel: (B, D, S_pad) noise."""
    B, C, H, W = x.shape
    HW = H * W
    patches = _im2col_nchw(x, k=KSIZE, pad=KSIZE // 2)         # (B, HW, C*k*k) - no K-padding
    CK = patches.shape[-1]
    S_PAD = z_kernel.shape[-1]

    kernel = functools.partial(_combined_forward_kernel, samplesize=samplesize, hw=HW)

    cost = pl.CostEstimate(                                    # real (unpadded) work
        flops=B * (2 * HW * CK * C_HIDDEN + 2 * HW * C_HIDDEN
                   + 4 * C_HIDDEN * NUM_FLOW_PARAMS
                   + 4 * D_TARGET * samplesize + 8 * NUM_FLOW_PARAMS),
        transcendentals=B * 3 * D_TARGET,
        bytes_accessed=4 * (patches.size + prep["w1"].size + prep["b1"].size
                            + 2 * N_PAD * N_PAD + 2 * N_PAD
                            + z_kernel.size + B * N_PAD),
    )

    out_pad = pl.pallas_call(
        kernel,
        out_shape=jax.ShapeDtypeStruct((B, 1, N_PAD), jnp.float32),
        grid=(B,),                                             # one batch item per grid step
        in_specs=[
            pl.BlockSpec((1, HW, CK), lambda b: (b, 0, 0)),            # patches (full rows, K=36)
            pl.BlockSpec((CK, N_PAD), lambda b: (0, 0)),               # conv weight (fetched once)
            pl.BlockSpec((1, N_PAD), lambda b: (0, 0)),                # conv bias
            pl.BlockSpec((N_PAD, N_PAD), lambda b: (0, 0)),            # fc head A (mu lanes)
            pl.BlockSpec((1, N_PAD), lambda b: (0, 0)),
            pl.BlockSpec((N_PAD, N_PAD), lambda b: (0, 0)),            # fc head L (log-sigma lanes)
            pl.BlockSpec((1, N_PAD), lambda b: (0, 0)),
            pl.BlockSpec((1, D_TARGET, S_PAD), lambda b: (b, 0, 0)),   # noise, S on lanes
        ],
        out_specs=pl.BlockSpec((1, 1, N_PAD), lambda b: (b, 0, 0)),
        compiler_params=pltpu.CompilerParams(dimension_semantics=("parallel",)),
        cost_estimate=cost,
    )(patches, prep["w1"], prep["b1"], prep["wA"], prep["bA"], prep["wL"], prep["bL"], z_kernel)

    return out_pad[:, 0, :NUM_FLOW_PARAMS]


def _reference_forward(x, params, z):
    """Pure-JAX reference of the same forward pass (for validation only)."""
    B = x.shape[0]
    patches = _im2col_nchw(x, k=KSIZE, pad=KSIZE // 2)
    w1m = params["conv_w"].reshape(params["conv_w"].shape[0], -1).T
    h = jnp.maximum(patches.reshape(-1, patches.shape[-1]) @ w1m + params["conv_b"], 0.0)
    pooled = h.reshape(B, -1, C_HIDDEN).mean(axis=1)
    fp = pooled @ params["fc_w"] + params["fc_b"]
    mu, sigma = fp[:, :D_TARGET], jnp.exp(fp[:, D_TARGET:])
    samples = mu[:, None, :] + sigma[:, None, :] * z
    means = samples.mean(axis=1)
    stds = jnp.sqrt(((samples - means[:, None, :]) ** 2).sum(axis=1) / (samples.shape[1] - 1))
    return jnp.concatenate([means, stds], axis=1)


if __name__ == "__main__":
    key = jax.random.PRNGKey(0)
    k_x, k_cw, k_cb, k_fw, k_fb, k_z = jax.random.split(key, 6)

    B, C, H, W = 2, 4, 16, 16
    S = 1000  # samplesize_per_batchitem default of CombinedModel.forward()

    x = jax.random.normal(k_x, (B, C, H, W), dtype=jnp.float32)

    params = {
        "conv_w": 0.1 * jax.random.normal(k_cw, (C_HIDDEN, C, KSIZE, KSIZE), dtype=jnp.float32),
        "conv_b": 0.1 * jax.random.normal(k_cb, (C_HIDDEN,), dtype=jnp.float32),
        "fc_w": 0.1 * jax.random.normal(k_fw, (C_HIDDEN, NUM_FLOW_PARAMS), dtype=jnp.float32),
        "fc_b": 0.1 * jax.random.normal(k_fb, (NUM_FLOW_PARAMS,), dtype=jnp.float32),
    }

    # Hoisted out of the per-call path (run once at init, per review).
    prep = prepare_params(params)

    # Deterministic base-distribution noise (torch RNG in the original -> JAX PRNG here),
    # converted to the kernel's (B, D, S_pad) layout once at the source.
    z = jax.random.normal(k_z, (B, S, D_TARGET), dtype=jnp.float32)
    zt = prepare_noise(z)

    out = combined_model_forward(x, prep, zt, samplesize=S)
    out = jax.block_until_ready(out)

    ref = _reference_forward(x, params, z)
    assert out.shape == (B, NUM_FLOW_PARAMS)
    assert jnp.allclose(out, ref, rtol=1e-4, atol=1e-4), (out, ref)

    print("KERNEL_OK")
</pallas_src>

<mosaic_0001>
module attributes {stable_mosaic.version = 11 : i64} {
  func.func @_combined_forward_kernel(%arg0: i32, %arg1: memref<1x256x36xf32, #tpu.memory_space<vmem>>, %arg2: memref<36x128xf32, #tpu.memory_space<vmem>>, %arg3: memref<1x128xf32, #tpu.memory_space<vmem>>, %arg4: memref<128x128xf32, #tpu.memory_space<vmem>>, %arg5: memref<1x128xf32, #tpu.memory_space<vmem>>, %arg6: memref<128x128xf32, #tpu.memory_space<vmem>>, %arg7: memref<1x128xf32, #tpu.memory_space<vmem>>, %arg8: memref<1x3x1024xf32, #tpu.memory_space<vmem>>, %arg9: memref<1x1x128xf32, #tpu.memory_space<vmem>>) attributes {dimension_semantics = [#tpu.dimension_semantics<parallel>], iteration_bounds = array<i64: 2>, scalar_prefetch = 0 : i64, scratch_operands = 0 : i64, tpu.core_type = #tpu.core_type<tc>, window_params = [{transform_indices = @transform_0, window_bounds = array<i64: 1, 256, 36>}, {pipeline_mode = #tpu.pipeline_mode<synchronous>, transform_indices = @transform_1, window_bounds = array<i64: 36, 128>}, {pipeline_mode = #tpu.pipeline_mode<synchronous>, transform_indices = @transform_2, window_bounds = array<i64: 1, 128>}, {pipeline_mode = #tpu.pipeline_mode<synchronous>, transform_indices = @transform_3, window_bounds = array<i64: 128, 128>}, {pipeline_mode = #tpu.pipeline_mode<synchronous>, transform_indices = @transform_4, window_bounds = array<i64: 1, 128>}, {pipeline_mode = #tpu.pipeline_mode<synchronous>, transform_indices = @transform_5, window_bounds = array<i64: 128, 128>}, {pipeline_mode = #tpu.pipeline_mode<synchronous>, transform_indices = @transform_6, window_bounds = array<i64: 1, 128>}, {transform_indices = @transform_7, window_bounds = array<i64: 1, 3, 1024>}, {transform_indices = @transform_8, window_bounds = array<i64: 1, 1, 128>}]} {
    %c0 = arith.constant 0 : index
    %c0_0 = arith.constant 0 : index
    %c0_1 = arith.constant 0 : index
    %0 = vector.load %arg1[%c0, %c0_0, %c0_1] : memref<1x256x36xf32, #tpu.memory_space<vmem>>, vector<1x256x36xf32>
    %1 = vector.shape_cast %0 : vector<1x256x36xf32> to vector<256x36xf32>
    %c0_2 = arith.constant 0 : index
    %c0_3 = arith.constant 0 : index
    %2 = vector.load %arg2[%c0_2, %c0_3] : memref<36x128xf32, #tpu.memory_space<vmem>>, vector<36x128xf32>
    %cst = arith.constant dense<0.000000e+00> : vector<256x128xf32>
    %3 = tpu.matmul %1, %2, %cst {dimension_numbers = #tpu.dot_dimension_numbers<[1], [0], [0], [1], [0, 0, 1, 1], [], []>} : vector<256x36xf32>, vector<36x128xf32>, vector<256x128xf32> -> vector<256x128xf32>
    %c0_4 = arith.constant 0 : index
    %c0_5 = arith.constant 0 : index
    %4 = vector.load %arg3[%c0_4, %c0_5] : memref<1x128xf32, #tpu.memory_space<vmem>>, vector<1x128xf32>
    %5 = vector.broadcast %4 : vector<1x128xf32> to vector<256x128xf32>
    %6 = arith.addf %3, %5 : vector<256x128xf32>
    %cst_6 = arith.constant 0.000000e+00 : f32
    %7 = vector.broadcast %cst_6 : f32 to vector<256x128xf32>
    %8 = arith.maximumf %6, %7 : vector<256x128xf32>
    %cst_7 = arith.constant dense<0.000000e+00> : vector<128xf32>
    %9 = vector.multi_reduction <add>, %8, %cst_7 [0] : vector<256x128xf32> to vector<128xf32>
    %10 = vector.shape_cast %9 : vector<128xf32> to vector<1x128xf32>
    %cst_8 = arith.constant 3.906250e-03 : f32
    %11 = vector.broadcast %cst_8 : f32 to vector<1x128xf32>
    %12 = arith.mulf %10, %11 : vector<1x128xf32>
    %c0_9 = arith.constant 0 : index
    %c0_10 = arith.constant 0 : index
    %13 = vector.load %arg4[%c0_9, %c0_10] : memref<128x128xf32, #tpu.memory_space<vmem>>, vector<128x128xf32>
    %cst_11 = arith.constant dense<0.000000e+00> : vector<1x128xf32>
    %14 = tpu.matmul %12, %13, %cst_11 {dimension_numbers = #tpu.dot_dimension_numbers<[1], [0], [0], [1], [0, 0, 1, 1], [], []>} : vector<1x128xf32>, vector<128x128xf32>, vector<1x128xf32> -> vector<1x128xf32>
    %c0_12 = arith.constant 0 : index
    %c0_13 = arith.constant 0 : index
    %15 = vector.load %arg5[%c0_12, %c0_13] : memref<1x128xf32, #tpu.memory_space<vmem>>, vector<1x128xf32>
    %16 = arith.addf %14, %15 : vector<1x128xf32>
    %c0_14 = arith.constant 0 : index
    %c0_15 = arith.constant 0 : index
    %17 = vector.load %arg6[%c0_14, %c0_15] : memref<128x128xf32, #tpu.memory_space<vmem>>, vector<128x128xf32>
    %cst_16 = arith.constant dense<0.000000e+00> : vector<1x128xf32>
    %18 = tpu.matmul %12, %17, %cst_16 {dimension_numbers = #tpu.dot_dimension_numbers<[1], [0], [0], [1], [0, 0, 1, 1], [], []>} : vector<1x128xf32>, vector<128x128xf32>, vector<1x128xf32> -> vector<1x128xf32>
    %c0_17 = arith.constant 0 : index
    %c0_18 = arith.constant 0 : index
    %19 = vector.load %arg7[%c0_17, %c0_18] : memref<1x128xf32, #tpu.memory_space<vmem>>, vector<1x128xf32>
    %20 = arith.addf %18, %19 : vector<1x128xf32>
    %21 = math.exp %20 : vector<1x128xf32>
    %c0_19 = arith.constant 0 : index
    %c0_20 = arith.constant 0 : index
    %c0_21 = arith.constant 0 : index
    %22 = vector.load %arg8[%c0_19, %c0_20, %c0_21] : memref<1x3x1024xf32, #tpu.memory_space<vmem>>, vector<1x3x1024xf32>
    %cst_22 = arith.constant dense<0.000000e+00> : vector<1x3xf32>
    %23 = vector.multi_reduction <add>, %22, %cst_22 [2] : vector<1x3x1024xf32> to vector<1x3xf32>
    %24 = arith.mulf %22, %22 : vector<1x3x1024xf32>
    %cst_23 = arith.constant dense<0.000000e+00> : vector<1x3xf32>
    %25 = vector.multi_reduction <add>, %24, %cst_23 [2] : vector<1x3x1024xf32> to vector<1x3xf32>
    %cst_24 = arith.constant 1.000000e-03 : f32
    %26 = vector.broadcast %cst_24 : f32 to vector<1x3xf32>
    %27 = arith.mulf %23, %26 : vector<1x3xf32>
    %28 = arith.mulf %27, %23 : vector<1x3xf32>
    %29 = arith.subf %25, %28 : vector<1x3xf32>
    %cst_25 = arith.constant 0.00100100099 : f32
    %30 = vector.broadcast %cst_25 : f32 to vector<1x3xf32>
    %31 = arith.mulf %29, %30 : vector<1x3xf32>
    %32 = math.sqrt %31 : vector<1x3xf32>
    %33 = tpu.iota {dimensions = array<i32: 0>} : vector<3x128xi32>
    %34 = tpu.iota {dimensions = array<i32: 1>} : vector<3x128xi32>
    %35 = arith.cmpi eq, %34, %33 : vector<3x128xi32>
    %36 = arith.extui %35 : vector<3x128xi1> to vector<3x128xi32>
    %37 = arith.sitofp %36 : vector<3x128xi32> to vector<3x128xf32>
    %c3_i32 = arith.constant 3 : i32
    %38 = vector.broadcast %c3_i32 : i32 to vector<3x128xi32>
    %39 = arith.addi %33, %38 : vector<3x128xi32>
    %40 = arith.cmpi eq, %34, %39 : vector<3x128xi32>
    %41 = arith.extui %40 : vector<3x128xi1> to vector<3x128xi32>
    %42 = arith.sitofp %41 : vector<3x128xi32> to vector<3x128xf32>
    %cst_26 = arith.constant dense<0.000000e+00> : vector<1x128xf32>
    %43 = tpu.matmul %27, %37, %cst_26 {dimension_numbers = #tpu.dot_dimension_numbers<[1], [0], [0], [1], [0, 0, 1, 1], [], []>} : vector<1x3xf32>, vector<3x128xf32>, vector<1x128xf32> -> vector<1x128xf32>
    %cst_27 = arith.constant dense<0.000000e+00> : vector<1x128xf32>
    %44 = tpu.matmul %32, %42, %cst_27 {dimension_numbers = #tpu.dot_dimension_numbers<[1], [0], [0], [1], [0, 0, 1, 1], [], []>} : vector<1x3xf32>, vector<3x128xf32>, vector<1x128xf32> -> vector<1x128xf32>
    %45 = arith.addf %43, %44 : vector<1x128xf32>
    %46 = arith.mulf %21, %45 : vector<1x128xf32>
    %47 = arith.addf %16, %46 : vector<1x128xf32>
    %c0_28 = arith.constant 0 : index
    %c0_29 = arith.constant 0 : index
    %c0_30 = arith.constant 0 : index
    %48 = vector.load %arg9[%c0_28, %c0_29, %c0_30] : memref<1x1x128xf32, #tpu.memory_space<vmem>>, vector<1x1x128xf32>
    %49 = vector.shape_cast %48 : vector<1x1x128xf32> to vector<1x128xf32>
    %50 = vector.shape_cast %47 : vector<1x128xf32> to vector<1x1x128xf32>
    tpu.vector_store %arg9[%c0_28, %c0_29, %c0_30], %50 {strides = array<i32>} : memref<1x1x128xf32, #tpu.memory_space<vmem>>, vector<1x1x128xf32>,
    return
  }
  func.func @transform_0(%arg0: i32) -> (i32, i32, i32) {
    %c0_i32 = arith.constant 0 : i32
    %c0_i32_0 = arith.constant 0 : i32
    %c0_i32_1 = arith.constant 0 : i32
    return %arg0, %c0_i32, %c0_i32_0 : i32, i32, i32
  }
  func.func @transform_1(%arg0: i32) -> (i32, i32) {
    %c0_i32 = arith.constant 0 : i32
    %c0_i32_0 = arith.constant 0 : i32
    %c0_i32_1 = arith.constant 0 : i32
    return %c0_i32, %c0_i32_0 : i32, i32
  }
  func.func @transform_2(%arg0: i32) -> (i32, i32) {
    %c0_i32 = arith.constant 0 : i32
    %c0_i32_0 = arith.constant 0 : i32
    %c0_i32_1 = arith.constant 0 : i32
    return %c0_i32, %c0_i32_0 : i32, i32
  }
  func.func @transform_3(%arg0: i32) -> (i32, i32) {
    %c0_i32 = arith.constant 0 : i32
    %c0_i32_0 = arith.constant 0 : i32
    %c0_i32_1 = arith.constant 0 : i32
    return %c0_i32, %c0_i32_0 : i32, i32
  }
  func.func @transform_4(%arg0: i32) -> (i32, i32) {
    %c0_i32 = arith.constant 0 : i32
    %c0_i32_0 = arith.constant 0 : i32
    %c0_i32_1 = arith.constant 0 : i32
    return %c0_i32, %c0_i32_0 : i32, i32
  }
  func.func @transform_5(%arg0: i32) -> (i32, i32) {
    %c0_i32 = arith.constant 0 : i32
    %c0_i32_0 = arith.constant 0 : i32
    %c0_i32_1 = arith.constant 0 : i32
    return %c0_i32, %c0_i32_0 : i32, i32
  }
  func.func @transform_6(%arg0: i32) -> (i32, i32) {
    %c0_i32 = arith.constant 0 : i32
    %c0_i32_0 = arith.constant 0 : i32
    %c0_i32_1 = arith.constant 0 : i32
    return %c0_i32, %c0_i32_0 : i32, i32
  }
  func.func @transform_7(%arg0: i32) -> (i32, i32, i32) {
    %c0_i32 = arith.constant 0 : i32
    %c0_i32_0 = arith.constant 0 : i32
    %c0_i32_1 = arith.constant 0 : i32
    return %arg0, %c0_i32, %c0_i32_0 : i32, i32, i32
  }
  func.func @transform_8(%arg0: i32) -> (i32, i32, i32) {
    %c0_i32 = arith.constant 0 : i32
    %c0_i32_0 = arith.constant 0 : i32
    %c0_i32_1 = arith.constant 0 : i32
    return %arg0, %c0_i32, %c0_i32_0 : i32, i32, i32
  }
}

</mosaic_0001>

<bundles_post_ra>
// kernel: combined_model_forward.1
= control target key start
LH: loop header
LB: loop body
LE: loop exit
PB: predicated region body
PF: predicated region fallthrough
CT: control target
= control target key end

     0   :  { %13 = vsyncpa [#allocation3], 0  ;;  %s2132_s0 = inlined_call_operand.vmem [shape: f32[2,256,36], index: 0, kind: input, shape index: {}]   ;;  %s2133_s1 = inlined_call_operand.vmem [shape: f32[36,128], index: 1, kind: input, shape index: {}]   ;;  %s2134_s2 = inlined_call_operand.vmem [shape: f32[1,128], index: 2, kind: input, shape index: {}]   ;;  %s2135_s3 = inlined_call_operand.vmem [shape: f32[128,128], index: 3, kind: input, shape index: {}]   ;;  %s2136_s4 = inlined_call_operand.vmem [shape: f32[1,128], index: 4, kind: input, shape index: {}]   ;;  %s2137_s5 = inlined_call_operand.vmem [shape: f32[128,128], index: 5, kind: input, shape index: {}]   ;;  %s2138_s6 = inlined_call_operand.vmem [shape: f32[1,128], index: 6, kind: input, shape index: {}]   ;;  %s2139_s7 = inlined_call_operand.vmem [shape: f32[2,3,1024], index: 7, kind: input, shape index: {}]   ;;  %s2140_s8 = inlined_call_operand.hbm [shape: f32[2,1,128], index: 8, kind: output, shape index: {}]  }
   0x1   :  { %15 = vsyncpa [#allocation3 + $0x1], 0  ;;  %s1759_s27 = smov 0   ;;  %s1761_s28 = smov 0  }
   0x2   :  { %s1763_s29 = smov 0   ;;  %s1765_s30 = smov 0  }
   0x3 LB: > { %s1780_s9 = sadd.s32 4294967295, %s1708_s30   ;;  %s1272_s10 = sadd.s32 4294967294, %s1708_s30   ;;  %s1708_s30 = sphi %s1765_s30, %s2146_s30   ;;  %s1704_s29 = sphi %s1763_s29, %s2145_s29   ;;  %s1700_s28 = sphi %s1761_s28, %s2144_s28   ;;  %s1696_s27 = sphi %s1759_s27, %s2143_s27  }
   0x4   : > { %s1784_s11 = sadd.s32 1, %s1708_s30   ;;  %s206_s12 = sadd.s32 1, %s1704_s29 }
   0x5   : > { %s203_s13 = ssub.s32 %s1708_s30, %s1784_s11  ;;  %p216_p0 = scmp.ne.s32.totalorder %s1704_s29, %s1700_s28 }
   0x6   : > { %p204_p1 = scmp.eq.s32.totalorder %s203_s13, 0  ;;  %p217_p2 = scmp.eq.s32.totalorder %s1780_s9, 1 }
   0x7   : > { %p222_p3 = scmp.ne.s32.totalorder %s1700_s28, %s1696_s27  ;;  %p223_p4 = scmp.eq.s32.totalorder %s1272_s10, 1 }
   0x8   : > { %s1795_s14 = scalar_select %p204_p1, %s1704_s29, %s206_s12  }
   0x9   : > { %p1797_p5 = por %p217_p2, %p216_p0  ;;  %p1801_p6 = por %p223_p4, %p222_p3 }
   0xa   : > { %p1275_p7 = scmp.ge.s32.totalorder %s1708_s30, 1  ;;  %p275_p8 = scmp.lt.s32.totalorder %s1708_s30, 3 }
   0xc   : > { %p276_p9 = pnand %p1275_p7, %p275_p8 }
   0xd   : > { %v355_v0 = vld [vmem:[%s2133_s1] sm:$0xff] (!%p276_p9)  ;;  %v356_v1 = vld [vmem:[%s2133_s1 + $0x8] sm:$0xff] (!%p276_p9)  ;;  %v357_v2 = vld [vmem:[%s2133_s1 + $0x10] sm:$0xff] (!%p276_p9)  ;;  %p313_p10 = scmp.lt.s32.totalorder (!%p276_p9), %s1780_s9, 1  ;;  %vm367_vm0 = vcmask (!%p276_p9), 293888   ;;  %vm464_vm1 = vcmask (!%p276_p9), 1043456  }
   0xe   : > { %279 = sbr.rel (%p276_p9) target bundleno = 599 (0x257), region = 52  ;;  %v1538_v3 = vpack.c.bf16 (!%p276_p9), %v356_v1, %v355_v0  ;;  %v358_v4 = vld [vmem:[%s2133_s1 + $0x18] sm:$0xff] (!%p276_p9)  ;;  %v359_v6 = vld [vmem:[%s2133_s1 + $0x20] sm:$0xf] (!%p276_p9)  ;;  %vm955_vm2 = vcmask (!%p276_p9), 1042432   ;;  %vm1711_vm3 = vmmov (!%p276_p9), 0  }
   0xf   : > { %v1542_v5 = vpack.c.bf16 (!%p276_p9), %v358_v4, %v357_v2  ;;  %vm1033_vm8 = vcmask (!%p276_p9), 23552  }
  0x10   : > { %1539 = vmatprep.subr.bf16.mxu0 (!%p276_p9), %v1538_v3 }
  0x11   : > { %1541 = vmatpush3.bf16.msra.mxu0 (!%p276_p9), %v1538_v3 }
  0x12   : > { %1543 = vmatprep.subr.bf16.mxu0 (!%p276_p9), %v1542_v5 }
  0x15   : > { %s314_s25 = scalar_select %p313_p10, %s1780_s9, 1  ;;  %1545 = vmatpush3.bf16.msra.mxu0 %v1542_v5 }
  0x16   : > { %1408 = vmatprep.subr.msk.mxu0 %vm464_vm1, %v359_v6 }
  0x17   : > { %s1323_s26 = sshll.u32 %s314_s25, 8  ;;  %s1324_s19 = sshll.u32 %s314_s25, 5 }
  0x18   : > { %s1824_s13 = scalar_lea.vmem %s2132_s0, %s1323_s26  ;;  %s322_s22 = scalar_lea.vmem %s2139_s7, %s1324_s19 }
  0x19   : > { %v323_v7 = vld [vmem:[%s1824_s13] sm:$0xff]  ;;  %v324_v8 = vld [vmem:[%s1824_s13 + $0x8] sm:$0xff]  ;;  %v325_v9 = vld [vmem:[%s1824_s13 + $0x10] sm:$0xff]  ;;  %1409 = vmatpush3.msk.msra.mxu0 %vm464_vm1, %v359_v6  ;;  %s311_s26 = sand.u32 1, %s1700_s28  }
  0x1a   : > { %1410 = vmatprep.mubr.msk.f32.mxu0 %vm367_vm0, %v323_v7  ;;  %v326_v10 = vld [vmem:[%s1824_s13 + $0x18] sm:$0xff]  ;;  %v327_v11 = vld [vmem:[%s1824_s13 + $0x20] sm:$0xff]  ;;  %v940_v13 = vld [vmem:[%s322_s22 + $0x8] sm:$0x77]  ;;  %s312_s17 = scalar_lea.vmem [#allocation2], %s311_s26 }
  0x1b   : > { %1411 = vmatmul.mubr.msk.f32.vlgmr.msra.gmra.mrb[0].mxu0 %vm367_vm0, %v324_v8  ;;  %v939_v12 = vld [vmem:[%s322_s22] sm:$0x77]  ;;  %v941_v14 = vld [vmem:[%s322_s22 + $0x10] sm:$0x77]  ;;  %v328_v17 = vld [vmem:[%s1824_s13 + $0x28] sm:$0xff]  ;;  %v948_v18 = vcombine.high %v940_v13, %v940_v13  ;;  %v959_v22 = vsel %vm955_vm2, %v940_v13, 0.0  ;;  %v974_v27 = vmul.f32 %v940_v13, %v940_v13 }
  0x1c   : > { %1413 = vmatprep.mubr.msk.f32.mxu0 %vm367_vm0, %v325_v9  ;;  %v947_v15 = vcombine.high %v939_v12, %v939_v12  ;;  %v973_v16 = vmul.f32 %v939_v12, %v939_v12  ;;  %v956_v19 = vsel %vm955_vm2, %v939_v12, 0.0  ;;  %v329_v20 = vld [vmem:[%s1824_s13 + $0x30] sm:$0xff]  ;;  %v949_v23 = vcombine.high %v941_v14, %v941_v14  ;;  %v942_v25 = vld [vmem:[%s322_s22 + $0x18] sm:$0x77]  ;;  %v331_v33 = vld [vmem:[%s1824_s13 + $0x40] sm:$0xff]  ;;  %s1205_s18 = sshll.u32 %s312_s17, 4  ;;  %s2092_s18 = int_to_ptr.vmem [resolvable:$true] %s1205_s18 }
  0x1d   : > { %v961_v26 = vsel %vm955_vm2, %v948_v18, 0.0  ;;  %v975_v28 = vmul.f32 %v941_v14, %v941_v14  ;;  %v330_v30 = vld [vmem:[%s1824_s13 + $0x38] sm:$0xff]  ;;  %v963_v34 = vsel %vm955_vm2, %v941_v14, 0.0  ;;  %v982_v35 = vcombine.high %v974_v27, %v974_v27  ;;  %v332_v45 = vld [vmem:[%s1824_s13 + $0x48] sm:$0xff]  ;;  %v333_v48 = vld [vmem:[%s1824_s13 + $0x50] sm:$0xff]  ;;  %s1193_s22 = scalar_lea.sflag [#allocation3], %s311_s26 }
  0x1e   : > { %v957_v21 = vsel %vm955_vm2, %v947_v15, 0.0  ;;  %v981_v29 = vcombine.high %v973_v16, %v973_v16  ;;  %v989_v32 = vsel %vm955_vm2, %v973_v16, 0.0  ;;  %v950_v37 = vcombine.high %v942_v25, %v942_v25  ;;  %v334_v56 = vld [vmem:[%s1824_s13 + $0x58] sm:$0xff]  ;;  %v335_v59 = vld [vmem:[%s1824_s13 + $0x60] sm:$0xff]  ;;  %v336_v0 = vld [vmem:[%s1824_s13 + $0x68] sm:$0xff]  ;;  %s1646_s23 = scalar_lea.vmem %s2092_s18, 16 }
  0x1f   : > { %1414 = vmatmul.mubr.msk.f32.gmra.mrb[2].mxu0 %vm367_vm0, %v326_v10  ;;  %v958_v24 = vadd.f32 %v957_v21, %v956_v19  ;;  %v992_v40 = vsel %vm955_vm2, %v974_v27, 0.0  ;;  %v965_v41 = vsel %vm955_vm2, %v949_v23, 0.0  ;;  %v976_v42 = vmul.f32 %v942_v25, %v942_v25  ;;  %v337_v2 = vld [vmem:[%s1824_s13 + $0x70] sm:$0xff]  ;;  %v338_v4 = vld [vmem:[%s1824_s13 + $0x78] sm:$0xff]  ;;  %v339_v5 = vld [vmem:[%s1824_s13 + $0x80] sm:$0xff]  ;;  %p1647_p11 = scmp.ne.s32.totalorder %s2092_s18, %s1646_s23 }
  0x20   : > { %1416 = vmatprep.mubr.msk.f32.mxu0 %vm367_vm0, %v327_v11  ;;  %v990_v36 = vsel %vm955_vm2, %v981_v29, 0.0  ;;  %v983_v43 = vcombine.high %v975_v28, %v975_v28  ;;  %v994_v44 = vsel %vm955_vm2, %v982_v35, 0.0  ;;  %v967_v49 = vsel %vm955_vm2, %v942_v25, 0.0  ;;  %v340_v6 = vld [vmem:[%s1824_s13 + $0x88] sm:$0xff]  ;;  %v341_v7 = vld [vmem:[%s1824_s13 + $0x90] sm:$0xff]  ;;  %v342_v8 = vld [vmem:[%s1824_s13 + $0x98] sm:$0xff] }
  0x21   : > { %v960_v31 = vadd.f32 %v959_v22, %v958_v24  ;;  %v991_v39 = vadd.f32 %v990_v36, %v989_v32  ;;  %v996_v50 = vsel %vm955_vm2, %v975_v28, 0.0  ;;  %v969_v53 = vsel %vm955_vm2, %v950_v37, 0.0  ;;  %v343_v9 = vld [vmem:[%s1824_s13 + $0xa0] sm:$0xff]  ;;  %v344_v10 = vld [vmem:[%s1824_s13 + $0xa8] sm:$0xff]  ;;  %v345_v11 = vld [vmem:[%s1824_s13 + $0xb0] sm:$0xff]  ;;  %p1648_p12 = pnand %p1647_p11, %p1797_p5 }
  0x22   : > { %v984_v54 = vcombine.high %v976_v42, %v976_v42  ;;  %v998_v55 = vsel %vm955_vm2, %v983_v43, 0.0  ;;  %v1000_v60 = vsel %vm955_vm2, %v976_v42, 0.0  ;;  %v346_v12 = vld [vmem:[%s1824_s13 + $0xb8] sm:$0xff]  ;;  %v347_v13 = vld [vmem:[%s1824_s13 + $0xc0] sm:$0xff]  ;;  %v348_v14 = vld [vmem:[%s1824_s13 + $0xc8] sm:$0xff]  ;;  %v1710_v24 = vmov 0.0|0.0  }
  0x23   : > { %1417 = vmatmul.mubr.msk.f32.gmra.mrb[4].mxu0 %vm367_vm0, %v328_v17  ;;  %v962_v38 = vadd.f32 %v961_v26, %v960_v31  ;;  %v993_v47 = vadd.f32 %v992_v40, %v991_v39  ;;  %v349_v15 = vld [vmem:[%s1824_s13 + $0xd0] sm:$0xff]  ;;  %v350_v16 = vld [vmem:[%s1824_s13 + $0xd8] sm:$0xff]  ;;  %v351_v17 = vld [vmem:[%s1824_s13 + $0xe0] sm:$0xff]  ;;  %1546 = vmatprep.subr.bf16.mxu1 %v1710_v24  ;;  %p1649_p13 = pneg %p1648_p12 }
  0x24   : > { %1419 = vmatprep.mubr.msk.f32.mxu0 %vm367_vm0, %v329_v20  ;;  %v1002_v63 = vsel %vm955_vm2, %v984_v54, 0.0  ;;  %v352_v18 = vld [vmem:[%s1824_s13 + $0xe8] sm:$0xff]  ;;  %v353_v19 = vld [vmem:[%s1824_s13 + $0xf0] sm:$0xff]  ;;  %v354_v20 = vld [vmem:[%s1824_s13 + $0xf8] sm:$0xff]  ;;  %s1320_s13 = sshll.u32 %s1780_s9, 4  ;;  %s1713_s9 = smov [#allocation2]  }
  0x25   : > { %v964_v46 = vadd.f32 %v963_v34, %v962_v38  ;;  %v995_v52 = vadd.f32 %v994_v44, %v993_v47  ;;  %v763_v21 = vld [vmem:[%s2135_s3] sm:$0xff]  ;;  %v764_v22 = vld [vmem:[%s2135_s3 + $0x8] sm:$0xff]  ;;  %v765_v25 = vld [vmem:[%s2135_s3 + $0x10] sm:$0xff]  ;;  %s2090_s21 = scalar_lea.hbm %s2140_s8, %s1320_s13  ;;  %s1650_s24 = sshll.u32 %s1713_s9, 4  ;;  %s1651_s24 = int_to_ptr.vmem [resolvable:$false] %s1650_s24 }
  0x26   : > { %v1547_v23 = vpack.c.bf16 %v764_v22, %v763_v21  ;;  %v766_v26 = vld [vmem:[%s2135_s3 + $0x18] sm:$0xff]  ;;  %v767_v28 = vld [vmem:[%s2135_s3 + $0x20] sm:$0xff]  ;;  %v768_v29 = vld [vmem:[%s2135_s3 + $0x28] sm:$0xff]  ;;  %s1652_s25 = scalar_lea.vmem %s1651_s24, 32  ;;  %p1653_p0 = scmp.lt.s32.totalorder %s2092_s18, %s1651_s24 }
  0x27   : > { %1420 = vmatmul.mubr.msk.f32.gmra.mrb[6].mxu0 %vm367_vm0, %v330_v30  ;;  %v966_v51 = vadd.f32 %v965_v41, %v964_v46  ;;  %v997_v58 = vadd.f32 %v996_v50, %v995_v52  ;;  %v1550_v27 = vpack.c.bf16 %v766_v26, %v765_v25  ;;  %v1553_v30 = vpack.c.bf16 %v768_v29, %v767_v28  ;;  %v769_v31 = vld [vmem:[%s2135_s3 + $0x30] sm:$0xff]  ;;  %v770_v32 = vld [vmem:[%s2135_s3 + $0x38] sm:$0xff]  ;;  %v771_v34 = vld [vmem:[%s2135_s3 + $0x40] sm:$0xff]  ;;  %p1654_p1 = scmp.lt.s32.totalorder %s1652_s25, %s1646_s23 }
  0x28   : > { %1422 = vmatprep.mubr.msk.f32.mxu0 %vm367_vm0, %v331_v33  ;;  %1548 = vmatpush3.bf16.msra.mxu1 %v1547_v23  ;;  %v1556_v33 = vpack.c.bf16 %v770_v32, %v769_v31  ;;  %v772_v35 = vld [vmem:[%s2135_s3 + $0x48] sm:$0xff]  ;;  %v773_v37 = vld [vmem:[%s2135_s3 + $0x50] sm:$0xff]  ;;  %v774_v38 = vld [vmem:[%s2135_s3 + $0x58] sm:$0xff] }
  0x29   : > { %v968_v57 = vadd.f32 %v967_v49, %v966_v51  ;;  %v999_v62 = vadd.f32 %v998_v55, %v997_v58  ;;  %1549 = vmatprep.subr.bf16.mxu1 %v1710_v24  ;;  %v1559_v36 = vpack.c.bf16 %v772_v35, %v771_v34  ;;  %v1562_v39 = vpack.c.bf16 %v774_v38, %v773_v37  ;;  %v775_v40 = vld [vmem:[%s2135_s3 + $0x60] sm:$0xff]  ;;  %v776_v41 = vld [vmem:[%s2135_s3 + $0x68] sm:$0xff]  ;;  %v777_v43 = vld [vmem:[%s2135_s3 + $0x70] sm:$0xff]  ;;  %p1655_p2 = por %p1654_p1, %p1653_p0 }
  0x2a   : > { %v1565_v42 = vpack.c.bf16 %v776_v41, %v775_v40  ;;  %v778_v44 = vld [vmem:[%s2135_s3 + $0x78] sm:$0xff]  ;;  %v1974_v47 = vld [vmem:[%s2134_s2] ss:$0 sm:$0xff] }
  0x2b   : > { %1423 = vmatmul.mubr.msk.f32.gmra.mrb[8].mxu0 %vm367_vm0, %v332_v45  ;;  %v970_v61 = vadd.f32 %v969_v53, %v968_v57  ;;  %v1001_v1 = vadd.f32 %v1000_v60, %v999_v62  ;;  %v1712_v45 = vmov 0.0   ;;  %v1568_v46 = vpack.c.bf16 %v778_v44, %v777_v43  ;;  %p1656_p3 = pnand %p1655_p2, %p1649_p13 }
  0x2c   : > { %1425 = vmatprep.mubr.msk.f32.mxu0 %vm367_vm0, %v333_v48  ;;  %1551 = vmatpush3.bf16.msra.mxu1 %v1550_v27 }
  0x2d   : > { %971 = vadd.xlane.f32.xlu0 %v970_v61  ;;  %v1003_v3 = vadd.f32 %v1002_v63, %v1001_v1  ;;  %1552 = vmatprep.subr.bf16.mxu1 %v1710_v24 }
  0x2e   : > { %1490 = vmatprep.mubr.msk.f32.mxu1 %vm1711_vm3, %v1712_v45 }
  0x2f   : > { %1426 = vmatmul.mubr.msk.f32.gmra.mrb[10].mxu0 %vm367_vm0, %v334_v56 }
  0x30   : > { %1428 = vmatprep.mubr.msk.f32.mxu0 %vm367_vm0, %v335_v59  ;;  %1554 = vmatpush3.bf16.msra.mxu1 %v1553_v30 }
  0x31   : > { %1004 = vadd.xlane.f32.xlu0 %v1003_v3  ;;  %1555 = vmatprep.subr.bf16.mxu1 %v1710_v24 }
  0x33   : > { %1429 = vmatmul.mubr.msk.f32.gmra.mrb[12].mxu0 %vm367_vm0, %v336_v0 }
  0x34   : > { %1431 = vmatprep.mubr.msk.f32.mxu0 %vm367_vm0, %v337_v2  ;;  %1557 = vmatpush3.bf16.msra.mxu1 %v1556_v33 }
  0x35   : > { %1558 = vmatprep.subr.bf16.mxu1 %v1710_v24 }
  0x37   : > { %1432 = vmatmul.mubr.msk.f32.gmra.mrb[14].mxu0 %vm367_vm0, %v338_v4 }
  0x38   : > { %1434 = vmatprep.mubr.msk.f32.mxu0 %vm367_vm0, %v339_v5  ;;  %1560 = vmatpush3.bf16.msra.mxu1 %v1559_v36 }
  0x39   : > { %1561 = vmatprep.subr.bf16.mxu1 %v1710_v24 }
  0x3b   : > { %1435 = vmatmul.mubr.msk.f32.gmra.mrb[16].mxu0 %vm367_vm0, %v340_v6 }
  0x3c   : > { %1437 = vmatprep.mubr.msk.f32.mxu0 %vm367_vm0, %v341_v7  ;;  %1563 = vmatpush3.bf16.msra.mxu1 %v1562_v39 }
  0x3d   : > { %1564 = vmatprep.subr.bf16.mxu1 %v1710_v24 }
  0x3f   : > { %1438 = vmatmul.mubr.msk.f32.gmra.mrb[18].mxu0 %vm367_vm0, %v342_v8 }
  0x40   : > { %1440 = vmatprep.mubr.msk.f32.mxu0 %vm367_vm0, %v343_v9  ;;  %1566 = vmatpush3.bf16.msra.mxu1 %v1565_v42 }
  0x41   : > { %1567 = vmatprep.subr.bf16.mxu1 %v1710_v24 }
  0x43   : > { %1441 = vmatmul.mubr.msk.f32.gmra.mrb[20].mxu0 %vm367_vm0, %v344_v10 }
  0x44   : > { %1443 = vmatprep.mubr.msk.f32.mxu0 %vm367_vm0, %v345_v11  ;;  %1569 = vmatpush3.bf16.msra.mxu1 %v1568_v46 }
  0x45   : > { %1570 = vmatprep.subr.bf16.mxu1 %v1710_v24 }
  0x47   : > { %1444 = vmatmul.mubr.msk.f32.gmra.mrb[22].mxu0 %vm367_vm0, %v346_v12 }
  0x48   : > { %1446 = vmatprep.mubr.msk.f32.mxu0 %vm367_vm0, %v347_v13 }
  0x4b   : > { %1447 = vmatmul.mubr.msk.f32.gmra.mrb[24].mxu0 %vm367_vm0, %v348_v14 }
  0x4c   : > { %1449 = vmatprep.mubr.msk.f32.mxu0 %vm367_vm0, %v349_v15 }
  0x4f   : > { %1450 = vmatmul.mubr.msk.f32.gmra.mrb[26].mxu0 %vm367_vm0, %v350_v16 }
  0x50   : > { %1452 = vmatprep.mubr.msk.f32.mxu0 %vm367_vm0, %v351_v17 }
  0x53   : > { %1453 = vmatmul.mubr.msk.f32.gmra.mrb[28].mxu0 %vm367_vm0, %v352_v18 }
  0x54   : > { %1455 = vmatprep.mubr.msk.f32.mxu0 %vm367_vm0, %v353_v19 }
  0x57   : > { %1456 = vmatmul.mubr.msk.f32.gmra.mrb[30].mxu0 %vm367_vm0, %v354_v20 }
  0xee   : > { %v1412_v48 = vpop.f32.mrb[0].mxu0 }
  0xef   : > { %v540_v49 = vadd.f32 %v1412_v48, %v1974_v47  ;;  %v534_v50 = vpop.f32.mrb[1].mxu0 }
  0xf0   : > { %v535_v51 = vadd.f32 %v1974_v47, %v534_v50 }
  0xf1   : > { %v694_v52 = vmax.f32 %v540_v49, 0.0 }
  0xf2   : > { %v693_v53 = vmax.f32 %v535_v51, 0.0  ;;  %v1415_v54 = vpop.f32.mrb[2].mxu0 }
  0xf3   : > { %v544_v55 = vpop.f32.mrb[3].mxu0  ;;  %v550_v57 = vadd.f32 %v1415_v54, %v1974_v47 }
  0xf4   : > { %v725_v56 = vadd.f32 %v694_v52, %v693_v53  ;;  %v545_v58 = vadd.f32 %v1974_v47, %v544_v55 }
  0xf5   : > { %v696_v62 = vmax.f32 %v550_v57, 0.0 }
  0xf6   : > { %v695_v59 = vmax.f32 %v545_v58, 0.0  ;;  %v1418_v60 = vpop.f32.mrb[4].mxu0 }
  0xf7   : > { %v554_v61 = vpop.f32.mrb[5].mxu0  ;;  %v560_v0 = vadd.f32 %v1418_v60, %v1974_v47 }
  0xf8   : > { %v726_v63 = vadd.f32 %v725_v56, %v695_v59  ;;  %v555_v1 = vadd.f32 %v1974_v47, %v554_v61 }
  0xf9   : > { %v698_v6 = vmax.f32 %v560_v0, 0.0 }
  0xfa   : > { %v697_v2 = vmax.f32 %v555_v1, 0.0  ;;  %v727_v3 = vadd.f32 %v726_v63, %v696_v62  ;;  %v1421_v4 = vpop.f32.mrb[6].mxu0 }
  0xfb   : > { %v564_v5 = vpop.f32.mrb[7].mxu0  ;;  %v570_v8 = vadd.f32 %v1421_v4, %v1974_v47 }
  0xfc   : > { %v728_v7 = vadd.f32 %v727_v3, %v697_v2  ;;  %v565_v9 = vadd.f32 %v1974_v47, %v564_v5 }
  0xfd   : > { %v700_v14 = vmax.f32 %v570_v8, 0.0 }
  0xfe   : > { %v699_v10 = vmax.f32 %v565_v9, 0.0  ;;  %v729_v11 = vadd.f32 %v728_v7, %v698_v6  ;;  %v1424_v12 = vpop.f32.mrb[8].mxu0 }
  0xff   : > { %v574_v13 = vpop.f32.mrb[9].mxu0  ;;  %v580_v16 = vadd.f32 %v1424_v12, %v1974_v47 }
 0x100   : > { %v730_v15 = vadd.f32 %v729_v11, %v699_v10  ;;  %v575_v17 = vadd.f32 %v1974_v47, %v574_v13 }
 0x101   : > { %v702_v22 = vmax.f32 %v580_v16, 0.0 }
 0x102   : > { %v701_v18 = vmax.f32 %v575_v17, 0.0  ;;  %v731_v19 = vadd.f32 %v730_v15, %v700_v14  ;;  %v1427_v20 = vpop.f32.mrb[10].mxu0 }
 0x103   : > { %v584_v21 = vpop.f32.mrb[11].mxu0  ;;  %v590_v25 = vadd.f32 %v1427_v20, %v1974_v47 }
 0x104   : > { %v732_v23 = vadd.f32 %v731_v19, %v701_v18  ;;  %v585_v26 = vadd.f32 %v1974_v47, %v584_v21 }
 0x105   : > { %v704_v31 = vmax.f32 %v590_v25, 0.0 }
 0x106   : > { %v703_v27 = vmax.f32 %v585_v26, 0.0  ;;  %v733_v28 = vadd.f32 %v732_v23, %v702_v22  ;;  %v1430_v29 = vpop.f32.mrb[12].mxu0 }
 0x107   : > { %v594_v30 = vpop.f32.mrb[13].mxu0  ;;  %v600_v33 = vadd.f32 %v1430_v29, %v1974_v47 }
 0x108   : > { %v734_v32 = vadd.f32 %v733_v28, %v703_v27  ;;  %v595_v34 = vadd.f32 %v1974_v47, %v594_v30 }
 0x109   : > { %v706_v39 = vmax.f32 %v600_v33, 0.0 }
 0x10a   : > { %v705_v35 = vmax.f32 %v595_v34, 0.0  ;;  %v735_v36 = vadd.f32 %v734_v32, %v704_v31  ;;  %v1433_v37 = vpop.f32.mrb[14].mxu0 }
 0x10b   : > { %v604_v38 = vpop.f32.mrb[15].mxu0  ;;  %v610_v41 = vadd.f32 %v1433_v37, %v1974_v47 }
 0x10c   : > { %v736_v40 = vadd.f32 %v735_v36, %v705_v35  ;;  %v605_v42 = vadd.f32 %v1974_v47, %v604_v38 }
 0x10d   : > { %v708_v49 = vmax.f32 %v610_v41, 0.0 }
 0x10e   : > { %v707_v43 = vmax.f32 %v605_v42, 0.0  ;;  %v737_v44 = vadd.f32 %v736_v40, %v706_v39  ;;  %v1436_v46 = vpop.f32.mrb[16].mxu0 }
 0x10f   : > { %v614_v48 = vpop.f32.mrb[17].mxu0  ;;  %v620_v51 = vadd.f32 %v1436_v46, %v1974_v47 }
 0x110   : > { %v738_v50 = vadd.f32 %v737_v44, %v707_v43  ;;  %v615_v52 = vadd.f32 %v1974_v47, %v614_v48 }
 0x111   : > { %v710_v57 = vmax.f32 %v620_v51, 0.0 }
 0x112   : > { %v709_v53 = vmax.f32 %v615_v52, 0.0  ;;  %v739_v54 = vadd.f32 %v738_v50, %v708_v49  ;;  %v1439_v55 = vpop.f32.mrb[18].mxu0 }
 0x113   : > { %v624_v56 = vpop.f32.mrb[19].mxu0  ;;  %v630_v59 = vadd.f32 %v1439_v55, %v1974_v47 }
 0x114   : > { %v740_v58 = vadd.f32 %v739_v54, %v709_v53  ;;  %v625_v60 = vadd.f32 %v1974_v47, %v624_v56  ;;  %v972_v56 = vpop.xlane.xlu0 %971 }
 0x115   : > { %v712_v1 = vmax.f32 %v630_v59, 0.0  ;;  %v850_v59 = vld [vmem:[%s2137_s5] sm:$0xff] }
 0x116   : > { %v711_v61 = vmax.f32 %v625_v60, 0.0  ;;  %v741_v62 = vadd.f32 %v740_v58, %v710_v57  ;;  %v1442_v63 = vpop.f32.mrb[20].mxu0  ;;  %v851_v60 = vld [vmem:[%s2137_s5 + $0x8] sm:$0xff] }
 0x117   : > { %v634_v0 = vpop.f32.mrb[21].mxu0  ;;  %v640_v3 = vadd.f32 %v1442_v63, %v1974_v47 }
 0x118   : > { %v742_v2 = vadd.f32 %v741_v62, %v711_v61  ;;  %v635_v4 = vadd.f32 %v1974_v47, %v634_v0  ;;  %v1571_v62 = vpack.c.bf16 %v851_v60, %v850_v59  ;;  %v852_v0 = vld [vmem:[%s2137_s5 + $0x10] sm:$0xff] }
 0x119   : > { %v714_v9 = vmax.f32 %v640_v3, 0.0  ;;  %v1005_v3 = vpop.xlane.xlu0 %1004 }
 0x11a   : > { %v713_v5 = vmax.f32 %v635_v4, 0.0  ;;  %v743_v6 = vadd.f32 %v742_v2, %v712_v1  ;;  %v1445_v7 = vpop.f32.mrb[22].mxu0  ;;  %v853_v1 = vld [vmem:[%s2137_s5 + $0x18] sm:$0xff] }
 0x11b   : > { %v644_v8 = vpop.f32.mrb[23].mxu0  ;;  %v650_v11 = vadd.f32 %v1445_v7, %v1974_v47  ;;  %v1574_v4 = vpack.c.bf16 %v853_v1, %v852_v0 }
 0x11c   : > { %v744_v10 = vadd.f32 %v743_v6, %v713_v5  ;;  %v645_v12 = vadd.f32 %v1974_v47, %v644_v8  ;;  %v854_v5 = vld [vmem:[%s2137_s5 + $0x20] sm:$0xff]  ;;  %v855_v6 = vld [vmem:[%s2137_s5 + $0x28] sm:$0xff] }
 0x11d   : > { %v716_v17 = vmax.f32 %v650_v11, 0.0  ;;  %v1577_v8 = vpack.c.bf16 %v855_v6, %v854_v5 }
 0x11e   : > { %v715_v13 = vmax.f32 %v645_v12, 0.0  ;;  %v745_v14 = vadd.f32 %v744_v10, %v714_v9  ;;  %v1448_v15 = vpop.f32.mrb[24].mxu0  ;;  %v856_v9 = vld [vmem:[%s2137_s5 + $0x30] sm:$0xff]  ;;  %v857_v10 = vld [vmem:[%s2137_s5 + $0x38] sm:$0xff] }
 0x11f   : > { %v654_v16 = vpop.f32.mrb[25].mxu0  ;;  %v660_v19 = vadd.f32 %v1448_v15, %v1974_v47  ;;  %v1580_v12 = vpack.c.bf16 %v857_v10, %v856_v9 }
 0x120   : > { %v746_v18 = vadd.f32 %v745_v14, %v715_v13  ;;  %v655_v20 = vadd.f32 %v1974_v47, %v654_v16  ;;  %v858_v13 = vld [vmem:[%s2137_s5 + $0x40] sm:$0xff]  ;;  %v859_v14 = vld [vmem:[%s2137_s5 + $0x48] sm:$0xff]  ;;  %v860_v16 = vld [vmem:[%s2137_s5 + $0x50] sm:$0xff] }
 0x121   : > { %v718_v26 = vmax.f32 %v660_v19, 0.0  ;;  %v1583_v15 = vpack.c.bf16 %v859_v14, %v858_v13 }
 0x122   : > { %v717_v21 = vmax.f32 %v655_v20, 0.0  ;;  %v747_v22 = vadd.f32 %v746_v18, %v716_v17  ;;  %v1451_v23 = vpop.f32.mrb[26].mxu0  ;;  %v861_v17 = vld [vmem:[%s2137_s5 + $0x58] sm:$0xff]  ;;  %v1017_v18 = vlaneseq  ;;  %v862_v20 = vld [vmem:[%s2137_s5 + $0x60] sm:$0xff] }
 0x123   : > { %v664_v25 = vpop.f32.mrb[27].mxu0  ;;  %v670_v28 = vadd.f32 %v1451_v23, %v1974_v47  ;;  %v1586_v19 = vpack.c.bf16 %v861_v17, %v860_v16 }
 0x124   : > { %v748_v27 = vadd.f32 %v747_v22, %v717_v21  ;;  %v665_v29 = vadd.f32 %v1974_v47, %v664_v25  ;;  %v863_v21 = vld [vmem:[%s2137_s5 + $0x68] sm:$0xff]  ;;  %v1018_v23 = vshrl.u32 %v1017_v18, 7 }
 0x125   : > { %v720_v34 = vmax.f32 %v670_v28, 0.0  ;;  %v1589_v25 = vpack.c.bf16 %v863_v21, %v862_v20 }
 0x126   : > { %v719_v30 = vmax.f32 %v665_v29, 0.0  ;;  %v749_v31 = vadd.f32 %v748_v27, %v718_v26  ;;  %v1454_v32 = vpop.f32.mrb[28].mxu0  ;;  %v864_v26 = vld [vmem:[%s2137_s5 + $0x70] sm:$0xff]  ;;  %v865_v27 = vld [vmem:[%s2137_s5 + $0x78] sm:$0xff]  ;;  %v1024_v28 = vadd.s32 3, %v1018_v23 }
 0x127   : > { %v674_v33 = vpop.f32.mrb[29].mxu0  ;;  %v680_v36 = vadd.f32 %v1454_v32, %v1974_v47 }
 0x128   : > { %v750_v35 = vadd.f32 %v749_v31, %v719_v30  ;;  %v675_v37 = vadd.f32 %v1974_v47, %v674_v33  ;;  %v1020_v30 = vand.u32 127, %v1017_v18  ;;  %v1592_v31 = vpack.c.bf16 %v865_v27, %v864_v26 }
 0x129   : > { %v722_v42 = vmax.f32 %v680_v36, 0.0 }
 0x12a   : > { %v721_v38 = vmax.f32 %v675_v37, 0.0  ;;  %v751_v39 = vadd.f32 %v750_v35, %v720_v34  ;;  %v1457_v40 = vpop.f32.mrb[30].mxu0  ;;  %vm1025_vm5 = vcmp.eq.s32.totalorder %v1020_v30, %v1024_v28  ;;  %vm1021_vm7 = vcmp.eq.s32.totalorder %v1020_v30, %v1018_v23 }
 0x12b   : > { %v684_v41 = vpop.f32.mrb[31].mxu0  ;;  %v690_v44 = vadd.f32 %v1457_v40, %v1974_v47  ;;  %v1315_v34 = vsel %vm1025_vm5, 1.0, %v1712_v45  ;;  %v1031_v36 = vsub.s32 %v1020_v30, %v1018_v23  ;;  %v1314_v37 = vsel %vm1021_vm7, 1.0, %v1712_v45 }
 0x12c   : > { %v752_v43 = vadd.f32 %v751_v39, %v721_v38  ;;  %v685_v46 = vadd.f32 %v1974_v47, %v684_v41  ;;  %v2014_v47 = vmul.f32 0.001, %v972_v56  ;;  %v866_v41 = vld [vmem:[%s2138_s6] sm:$0x1] }
 0x12d   : > { %v724_v50 = vmax.f32 %v690_v44, 0.0 }
 0x12e   : > { %v723_v48 = vmax.f32 %v685_v46, 0.0  ;;  %v753_v49 = vadd.f32 %v752_v43, %v722_v42  ;;  %v1007_v2 = vmul.f32 %v2014_v47, %v972_v56  ;;  %v1113_v38 = vrot.slane %v2014_v47, %v1031_v36 }
 0x130   : > { %v754_v51 = vadd.f32 %v753_v49, %v723_v48  ;;  %v1008_v7 = vsub.f32 %v1005_v3, %v1007_v2 }
 0x132   : > { %v755_v52 = vadd.f32 %v754_v51, %v724_v50  ;;  %v1009_v11 = vmul.f32 0.001001001, %v1008_v7 }
 0x134   : > { %v756_v53 = vrot.slane %v755_v52, 4  ;;  %1642 = vrsqrt.f32 %v1009_v11  ;;  %vm1012_vm4 = vcmp.eq.f32.partialorder %v1009_v11, inf  ;;  %v1015_v32 = vand.u32 2147483648, %v1009_v11 }
 0x135   : > { %vm1014_vm6 = vcmp.eq.f32.partialorder %v1009_v11, 0.0 }
 0x136   : > { %v757_v54 = vadd.f32 %v756_v53, %v755_v52 }
 0x138   : > { %v758_v55 = vrot.slane %v757_v54, 2 }
 0x13a   : > { %v759_v57 = vadd.f32 %v758_v55, %v757_v54 }
 0x13c   : > { %v760_v58 = vrot.slane %v759_v57, 1 }
 0x13e   : > { %v761_v61 = vadd.f32 %v760_v58, %v759_v57  ;;  %v1643_v22 = vpop.eup %1642 }
 0x13f   : > { %v1011_v29 = vmul.f32 %v1643_v22, %v1009_v11 }
 0x140   : > { %v762_v63 = vmul.f32 0.00390625, %v761_v61 }
 0x141   : > { %v1013_v33 = vsel %vm1012_vm4, %v1009_v11, %v1011_v29 }
 0x142   : > { %1491 = vmatmul.mubr.f32.vlgmr.msra.gmra.mrb[0].mxu1 %v762_v63  ;;  %v1016_v35 = vsel %vm1014_vm6, %v1015_v32, %v1013_v33 }
 0x143   : > { %1572 = vmatpush3.bf16.msra.mxu1 %v1571_v62  ;;  %1525 = vmatprep.mubr.msk.f32.mxu1 %vm1711_vm3, %v1712_v45 }
 0x144   : > { %1573 = vmatprep.subr.bf16.mxu1 %v1710_v24 }
 0x147   : > { %1575 = vmatpush3.bf16.msra.mxu1 %v1574_v4 }
 0x148   : > { %1576 = vmatprep.subr.bf16.mxu1 %v1710_v24 }
 0x14b   : > { %1578 = vmatpush3.bf16.msra.mxu1 %v1577_v8 }
 0x14c   : > { %1579 = vmatprep.subr.bf16.mxu1 %v1710_v24 }
 0x14f   : > { %1581 = vmatpush3.bf16.msra.mxu1 %v1580_v12 }
 0x150   : > { %1582 = vmatprep.subr.bf16.mxu1 %v1710_v24 }
 0x153   : > { %1584 = vmatpush3.bf16.msra.mxu1 %v1583_v15 }
 0x154   : > { %1585 = vmatprep.subr.bf16.mxu1 %v1710_v24 }
 0x157   : > { %1587 = vmatpush3.bf16.msra.mxu1 %v1586_v19 }
 0x158   : > { %1588 = vmatprep.subr.bf16.mxu1 %v1710_v24 }
 0x15b   : > { %1590 = vmatpush3.bf16.msra.mxu1 %v1589_v25 }
 0x15c   : > { %1591 = vmatprep.subr.bf16.mxu1 %v1710_v24  ;;  %v1032_v24 = vrot.slane %v1016_v35, %v1031_v36 }
 0x15f   : > { %1593 = vmatpush3.bf16.msra.mxu1 %v1592_v31 }
 0x160   : > { %1528 = vmatprep.subr.mxu1 %v1712_v45 }
 0x162   : > { %1526 = vmatmul.mubr.f32.vlgmr.msra.gmra.mrb[2].mxu1 %v762_v63 }
 0x163   : > { %1529 = vmatpush3.msk.msra.mxu1 %vm955_vm2, %v1315_v34  ;;  %1530 = vmatprep.mubr.msk.f32.mxu1 %vm1711_vm3, %v1712_v45 }
 0x164   : > { %1533 = vmatprep.subr.mxu1 %v1712_v45 }
 0x166   : > { %1531 = vmatmul.mubr.msk.f32.vlgmr.msra.gmra.mrb[4].mxu1 %vm1033_vm8, %v1032_v24 }
 0x167   : > { %1534 = vmatpush3.msk.msra.mxu1 %vm955_vm2, %v1314_v37  ;;  %1535 = vmatprep.mubr.msk.f32.mxu1 %vm1711_vm3, %v1712_v45  ;;  %v779_v45 = vld [vmem:[%s2136_s4] sm:$0x1] }
 0x16e   : > { %1536 = vmatmul.mubr.msk.f32.vlgmr.msra.gmra.mrb[4].mxu1 %vm1033_vm8, %v1113_v38 }
 0x215   : > { %v846_v39 = vpop.f32.mrb[0].mxu1 }
 0x216   : > { %v1492_v40 = vpop.f32.mrb[1].mxu1  ;;  %v847_v51 = vadd.f32 %v846_v39, %v779_v45 }
 0x235   : > { %v933_v42 = vpop.f32.mrb[2].mxu1 }
 0x236   : > { %v934_v43 = vadd.f32 %v933_v42, %v866_v41  ;;  %v1527_v44 = vpop.f32.mrb[3].mxu1 }
 0x238   : > { %v937_v46 = vmul.f32 1.442695, %v934_v43 }
 0x23a   : > { %1644 = vpow2.f32 %v937_v46 }
 0x241   : > { %v1185_v48 = vpop.f32.mrb[4].mxu1 }
 0x242   : > { %v1537_v49 = vpop.f32.mrb[5].mxu1 }
 0x244   : > { %v1645_v50 = vpop.eup %1644 }
 0x245   : > { %v1189_v52 = vmul.f32 %v1645_v50, %v1185_v48 }
 0x247   : > { %v1190_v53 = vadd.f32 %v1189_v52, %v847_v51 }
 0x249   : > { %1191 = vst [vmem:[%s312_s17] sm:$0x1] %v1190_v53 }
 0x24a   : > { %1659 = shalt.err (!%p1656_p3)
}
 0x24b   : > { %s1660_s26 = scalar_lea.hbm %s2090_s21, 16  ;;  %s1664_s13 = scalar_lea.hbm %s2140_s8, 32 }
 0x24c   : > { %p1661_p4 = scmp.ne.s32.totalorder %s2090_s21, %s1660_s26  ;;  %p1665_p9 = scmp.lt.u32.totalorder %s2090_s21, %s2140_s8 }
 0x24d   : > { %p1666_p10 = scmp.lt.u32.totalorder %s1664_s13, %s1660_s26  ;;  %p1668_p12 = scmp.lt.u32.totalorder %s1660_s26, %s2090_s21 }
 0x24e   : > { %p1662_p7 = pnand %p1661_p4, %p1797_p5 }
 0x24f   : > { %p1667_p11 = por %p1666_p10, %p1665_p9 }
 0x250   : > { %p1663_p8 = pneg %p1662_p7 }
 0x251   : > { %p1669_p13 = por %p1668_p12, %p1667_p11 }
 0x253   : > { %p1670_p0 = pnand %p1669_p13, %p1663_p8 }
 0x255   : > { %1673 = shalt.err (!%p1670_p0)
}
 0x256   : > { %1596 = dma.vmem_to_hbm [thread:$0]  (%p1797_p5), %s2092_s18, 16, %s2090_s21, %s1193_s22  }
 0x257 PF: > { %p1602_p1 = scmp.ge.s32.totalorder %s1708_s30, 2  ;;  %s1217_s20 = sand.u32 1, %s1696_s27  }
 0x258   : > { %s1218_s23 = scalar_lea.sflag [#allocation3], %s1217_s20 }
 0x259   : > { %p1599_p2 = pnand %p1602_p1, %p1801_p6 }
 0x25b   : > { %1691 = dma.done.wait (!%p1599_p2), %s1218_s23, 16  }
 0x25c   : > { %1693 = vsyncadd (!%p1599_p2), %s1218_s23, 4294967280  ;;  %p18_p3 = scmp.ge.s32.totalorder %s1784_s11, 4   ;;  %s2143_s27 = smov %s1700_s28 }
 0x25d   : > { %s2144_s28 = smov %s1704_s29  ;;  %s2145_s29 = smov %s1795_s14 }
 0x25e   : > { %s2146_s30 = smov %s1784_s11  ;;  %20 = sbr.rel (!%p18_p3) target bundleno = 3 (0x3), region = 90 }
 0x265   :  { %1222 = vsyncpa [#allocation3], 1 }
 0x266   :  { %1224 = vsyncpa [#allocation3 + $0x1], 1 }

</bundles_post_ra>
